<compile_context>
chip_gen: v7x
topology: tpu7x:2x2x1
jax: 0.10.0
libtpu: 0.0.40
codegen_flags: <defaults>
</compile_context>

<pallas_src>
import functools
import math

import jax
import jax.numpy as jnp
from jax.experimental import pallas as pl
from jax.experimental.pallas import tpu as pltpu


def _roll_seq(a, Bb, L, shift):
    """Circular roll by +/-1 along the sequence axis of a flat (Bb*L, D) array.

    Uses pltpu.roll (XLU sublane rotate, otherwise-idle slot).  A flat rotate
    wraps across sequence boundaries, so for Bb > 1 the Bb wrap rows are
    patched with a second rotate + select (no slice+concat copies).
    """
    N = Bb * L
    rolled = pltpu.roll(a, shift=shift % N, axis=0)
    if Bb == 1:
        return rolled
    t = jax.lax.broadcasted_iota(jnp.int32, a.shape, 0) % L
    if shift > 0:   # rows with t == 0 must read a[row + (L-1)]
        fix = pltpu.roll(a, shift=(-(L - 1)) % N, axis=0)
        return jnp.where(t == 0, fix, rolled)
    else:           # rows with t == L-1 must read a[row - (L-1)]
        fix = pltpu.roll(a, shift=(L - 1) % N, axis=0)
        return jnp.where(t == L - 1, fix, rolled)


def _data_embedding_kernel(xin_ref, w_ref, pe_ref, o_ref, *, Bb, L, D):
    # One MXU matmul over all four embeddings (bf16 operands, f32 accumulate).
    # Columns of y are [u0 | u1 | u2 | t_emb], each D wide (4*D = 128 lanes).
    y = jnp.dot(xin_ref[...], w_ref[...], preferred_element_type=jnp.float32)

    u0 = y[:, 0 * D:1 * D]
    u1 = y[:, 1 * D:2 * D]
    u2 = y[:, 2 * D:3 * D]
    t_emb = y[:, 3 * D:4 * D]

    # L-periodic positional embedding kept 2-D (no (Bb, L, D) broadcast).
    pe = pe_ref[...] if Bb == 1 else jnp.tile(pe_ref[...], (Bb, 1))

    # Circular conv combine: out[t] = u0[t-1] + u1[t] + u2[t+1]   (mod L).
    out = (_roll_seq(u0, Bb, L, 1) + u1 + _roll_seq(u2, Bb, L, -1)
           + t_emb + pe)

    o_ref[...] = out.astype(o_ref.dtype)
    # TODO(synk): nn.Dropout(p=0.1) is identity at inference and is not applied.


def _choose_batch_block(B, L, target_rows):
    """Largest divisor Bb of B with Bb*L <= target_rows (whole sequences per
    block — the circular conv needs the full sequence).  Multi-block grids
    need 8-aligned rows (f32 sublane tiling); Bb == B (single block whose
    shape equals the full array) is always legal."""
    best = None
    for Bb in range(1, B + 1):
        if B % Bb:
            continue
        rows = Bb * L
        if rows % 8 and Bb != B:
            continue
        if best is None or rows <= target_rows:
            best = Bb
    return best


def data_embedding(x, x_mark, params, *, block_rows_target=1024,
                   out_dtype=jnp.float32):
    B, L, C = x.shape
    F = x_mark.shape[-1]
    conv_w = params["conv_w"]                    # (3, C, D): tap-major Conv1d weight
    temp_w = params["temp_w"]                    # (F, D): timeF Linear (transposed)
    D = temp_w.shape[-1]
    pe = params["pe"][:L].astype(jnp.float32)    # PyTorch slices pe[:, :L]

    # Fused block weight (C+F, 4*D): column blocks [W0 | W1 | W2 | W_timeF];
    # x feeds rows 0..C-1, x_mark feeds rows C..C+F-1.
    CF = C + F
    w = jnp.zeros((CF, 4 * D), jnp.float32)
    w = w.at[:C, 0 * D:1 * D].set(conv_w[0])
    w = w.at[:C, 1 * D:2 * D].set(conv_w[1])
    w = w.at[:C, 2 * D:3 * D].set(conv_w[2])
    w = w.at[C:, 3 * D:4 * D].set(temp_w)
    w = w.astype(jnp.bfloat16)

    # bf16 activations, one lane-dense LHS stream of shape (B*L, C+F).
    # (In a full model this cast/concat fuses with the upstream producer.)
    xin = jnp.concatenate(
        [x.astype(jnp.bfloat16), x_mark.astype(jnp.bfloat16)], axis=-1,
    ).reshape(B * L, CF)

    Bb = _choose_batch_block(B, L, block_rows_target)
    R = Bb * L                       # rows per grid step (whole sequences)
    grid = (B // Bb,)
    rows = B * L
    out_itemsize = jnp.dtype(out_dtype).itemsize

    # Advisory cost hint: HBM-bound, one (rows, C+F) @ (C+F, 4D) matmul.
    cost = pl.CostEstimate(
        flops=2 * rows * CF * 4 * D,
        transcendentals=0,
        bytes_accessed=(rows * CF * 2          # bf16 activations in
                        + rows * D * out_itemsize   # output
                        + CF * 4 * D * 2       # fused weight
                        + L * D * 4),          # positional embedding
    )

    kernel = functools.partial(_data_embedding_kernel, Bb=Bb, L=L, D=D)

    out = pl.pallas_call(
        kernel,
        out_shape=jax.ShapeDtypeStruct((rows, D), out_dtype),
        grid=grid,
        in_specs=[
            pl.BlockSpec((R, CF), lambda i: (i, 0)),        # [x | x_mark] rows
            pl.BlockSpec((CF, 4 * D), lambda i: (0, 0)),    # fused weights (resident)
            pl.BlockSpec((L, D), lambda i: (0, 0)),         # positional embedding
        ],
        out_specs=pl.BlockSpec((R, D), lambda i: (i, 0)),
        compiler_params=pltpu.CompilerParams(
            dimension_semantics=("parallel",),
            vmem_limit_bytes=32 * 1024 * 1024,
        ),
        cost_estimate=cost,
    )(xin, w, pe)

    # Free row-major reshape back to (B, L, D).
    return out.reshape(B, L, D)


def make_positional_embedding(L, D):
    position = jnp.arange(L, dtype=jnp.float32)[:, None]
    div_term = jnp.exp(jnp.arange(0, D, 2, dtype=jnp.float32)
                       * (-(math.log(10000.0) / D)))
    pe = jnp.zeros((L, D), jnp.float32)
    pe = pe.at[:, 0::2].set(jnp.sin(position * div_term))
    pe = pe.at[:, 1::2].set(jnp.cos(position * div_term))
    return pe


def reference(x, x_mark, p):
    """Pure-JAX (f32) mirror of the PyTorch forward, for a sanity check."""
    y = 0.0
    for k in range(3):
        xs = jnp.roll(x, 1 - k, axis=1)                      # circular padding
        y = y + jnp.einsum("blc,cd->bld", xs, p["conv_w"][k])
    t_emb = jnp.einsum("blf,fd->bld", x_mark, p["temp_w"])
    return y + t_emb + p["pe"][None, :x.shape[1]]


if __name__ == "__main__":
    B, L, C, D, FEAT = 4, 8, 96, 32, 4   # c_in=96, d_model=32, freq='h' -> 4 feats

    key = jax.random.PRNGKey(0)
    k1, k2, k3, k4 = jax.random.split(key, 4)
    x = jax.random.normal(k1, (B, L, C), jnp.float32)
    x_mark = jax.random.normal(k2, (B, L, FEAT), jnp.float32)

    params = {
        # TokenEmbedding Conv1d weight, stored tap-major as (k, C, D)
        # (conv_w[k, c, d] == torch Conv1d weight[d, c, k]).
        "conv_w": jax.random.normal(k3, (3, C, D), jnp.float32)
                  * math.sqrt(2.0 / (3.0 * C)),
        # TimeFeatureEmbedding: Linear(4, D, bias=False), stored as (4, D).
        "temp_w": jax.random.normal(k4, (FEAT, D), jnp.float32)
                  / math.sqrt(float(FEAT)),
        # PositionalEmbedding (sinusoidal, first L rows).
        "pe": make_positional_embedding(L, D),
    }

    ref = reference(x, x_mark, params)

    # Exercise the three tiling regimes: single block holding the whole batch
    # (Bb=B), a multi-step grid with Bb>1 (wrap-row roll fix), and a
    # one-sequence-per-block grid.
    for target in (1024, 16, 8):
        out = data_embedding(x, x_mark, params, block_rows_target=target)
        jax.block_until_ready(out)
        assert out.shape == (B, L, D)
        max_err = float(jnp.max(jnp.abs(out - ref)))
        # bf16 activations/weights vs the f32 reference -> loose tolerance.
        assert max_err < 5e-2, f"block_rows_target={target}: max|err|={max_err}"

    print("KERNEL_OK")
</pallas_src>

<mosaic_0001>
module attributes {stable_mosaic.version = 11 : i64} {
  func.func @_data_embedding_kernel(%arg0: i32, %arg1: memref<32x100xbf16, #tpu.memory_space<vmem>>, %arg2: memref<100x128xbf16, #tpu.memory_space<vmem>>, %arg3: memref<8x32xf32, #tpu.memory_space<vmem>>, %arg4: memref<32x32xf32, #tpu.memory_space<vmem>>) attributes {dimension_semantics = [#tpu.dimension_semantics<parallel>], iteration_bounds = array<i64: 1>, scalar_prefetch = 0 : i64, scratch_operands = 0 : i64, tpu.core_type = #tpu.core_type<tc>, window_params = [{transform_indices = @transform_0, window_bounds = array<i64: 32, 100>}, {pipeline_mode = #tpu.pipeline_mode<synchronous>, transform_indices = @transform_1, window_bounds = array<i64: 100, 128>}, {pipeline_mode = #tpu.pipeline_mode<synchronous>, transform_indices = @transform_2, window_bounds = array<i64: 8, 32>}, {transform_indices = @transform_3, window_bounds = array<i64: 32, 32>}]} {
    %c0 = arith.constant 0 : index
    %c0_0 = arith.constant 0 : index
    %0 = vector.load %arg1[%c0, %c0_0] : memref<32x100xbf16, #tpu.memory_space<vmem>>, vector<32x100xbf16>
    %c0_1 = arith.constant 0 : index
    %c0_2 = arith.constant 0 : index
    %1 = vector.load %arg2[%c0_1, %c0_2] : memref<100x128xbf16, #tpu.memory_space<vmem>>, vector<100x128xbf16>
    %cst = arith.constant dense<0.000000e+00> : vector<32x128xf32>
    %2 = tpu.matmul %0, %1, %cst {dimension_numbers = #tpu.dot_dimension_numbers<[1], [0], [0], [1], [0, 0, 1, 1], [], []>} : vector<32x100xbf16>, vector<100x128xbf16>, vector<32x128xf32> -> vector<32x128xf32>
    %3 = vector.extract_strided_slice %2 {offsets = [0, 0], sizes = [32, 32], strides = [1, 1]} : vector<32x128xf32> to vector<32x32xf32>
    %4 = vector.extract_strided_slice %2 {offsets = [0, 32], sizes = [32, 32], strides = [1, 1]} : vector<32x128xf32> to vector<32x32xf32>
    %5 = vector.extract_strided_slice %2 {offsets = [0, 64], sizes = [32, 32], strides = [1, 1]} : vector<32x128xf32> to vector<32x32xf32>
    %6 = vector.extract_strided_slice %2 {offsets = [0, 96], sizes = [32, 32], strides = [1, 1]} : vector<32x128xf32> to vector<32x32xf32>
    %c0_3 = arith.constant 0 : index
    %c0_4 = arith.constant 0 : index
    %7 = vector.load %arg3[%c0_3, %c0_4] : memref<8x32xf32, #tpu.memory_space<vmem>>, vector<8x32xf32>
    %8 = tpu.concatenate %7, %7, %7, %7 in 0 : vector<8x32xf32>, vector<8x32xf32>, vector<8x32xf32>, vector<8x32xf32> -> vector<32x32xf32>
    %c1_i32 = arith.constant 1 : i32
    %9 = tpu.dynamic_rotate %3 by %c1_i32 dim 0 : vector<32x32xf32>, i32 -> vector<32x32xf32>
    %10 = tpu.iota {dimensions = array<i32: 0>} : vector<32x32xi32>
    %c8_i32 = arith.constant 8 : i32
    %c0_i32 = arith.constant 0 : i32
    %11 = arith.cmpi eq, %c8_i32, %c0_i32 : i32
    %c1_i32_5 = arith.constant 1 : i32
    %12 = arith.select %11, %c1_i32_5, %c8_i32 : i32
    %13 = vector.broadcast %12 : i32 to vector<32x32xi32>
    %14 = arith.remsi %10, %13 : vector<32x32xi32>
    %c0_i32_6 = arith.constant 0 : i32
    %15 = vector.broadcast %c0_i32_6 : i32 to vector<32x32xi32>
    %16 = arith.cmpi ne, %14, %15 : vector<32x32xi32>
    %c0_i32_7 = arith.constant 0 : i32
    %17 = vector.broadcast %c0_i32_7 : i32 to vector<32x32xi32>
    %18 = arith.cmpi slt, %14, %17 : vector<32x32xi32>
    %c0_i32_8 = arith.constant 0 : i32
    %19 = arith.cmpi slt, %12, %c0_i32_8 : i32
    %20 = vector.broadcast %19 : i1 to vector<32x32xi1>
    %21 = vector.broadcast %20 : vector<32x32xi1> to vector<32x32xi1>
    %22 = arith.xori %18, %21 : vector<32x32xi1>
    %23 = arith.andi %22, %16 : vector<32x32xi1>
    %24 = vector.broadcast %12 : i32 to vector<32x32xi32>
    %25 = arith.addi %14, %24 : vector<32x32xi32>
    %26 = arith.select %23, %25, %14 : vector<32x32xi1>, vector<32x32xi32>
    %c25_i32 = arith.constant 25 : i32
    %27 = tpu.dynamic_rotate %3 by %c25_i32 dim 0 : vector<32x32xf32>, i32 -> vector<32x32xf32>
    %c0_i32_9 = arith.constant 0 : i32
    %28 = vector.broadcast %c0_i32_9 : i32 to vector<32x32xi32>
    %29 = arith.cmpi eq, %26, %28 : vector<32x32xi32>
    %30 = arith.select %29, %27, %9 : vector<32x32xi1>, vector<32x32xf32>
    %31 = arith.addf %30, %4 : vector<32x32xf32>
    %c31_i32 = arith.constant 31 : i32
    %32 = tpu.dynamic_rotate %5 by %c31_i32 dim 0 : vector<32x32xf32>, i32 -> vector<32x32xf32>
    %33 = tpu.iota {dimensions = array<i32: 0>} : vector<32x32xi32>
    %c8_i32_10 = arith.constant 8 : i32
    %c0_i32_11 = arith.constant 0 : i32
    %34 = arith.cmpi eq, %c8_i32_10, %c0_i32_11 : i32
    %c1_i32_12 = arith.constant 1 : i32
    %35 = arith.select %34, %c1_i32_12, %c8_i32_10 : i32
    %36 = vector.broadcast %35 : i32 to vector<32x32xi32>
    %37 = arith.remsi %33, %36 : vector<32x32xi32>
    %c0_i32_13 = arith.constant 0 : i32
    %38 = vector.broadcast %c0_i32_13 : i32 to vector<32x32xi32>
    %39 = arith.cmpi ne, %37, %38 : vector<32x32xi32>
    %c0_i32_14 = arith.constant 0 : i32
    %40 = vector.broadcast %c0_i32_14 : i32 to vector<32x32xi32>
    %41 = arith.cmpi slt, %37, %40 : vector<32x32xi32>
    %c0_i32_15 = arith.constant 0 : i32
    %42 = arith.cmpi slt, %35, %c0_i32_15 : i32
    %43 = vector.broadcast %42 : i1 to vector<32x32xi1>
    %44 = vector.broadcast %43 : vector<32x32xi1> to vector<32x32xi1>
    %45 = arith.xori %41, %44 : vector<32x32xi1>
    %46 = arith.andi %45, %39 : vector<32x32xi1>
    %47 = vector.broadcast %35 : i32 to vector<32x32xi32>
    %48 = arith.addi %37, %47 : vector<32x32xi32>
    %49 = arith.select %46, %48, %37 : vector<32x32xi1>, vector<32x32xi32>
    %c7_i32 = arith.constant 7 : i32
    %50 = tpu.dynamic_rotate %5 by %c7_i32 dim 0 : vector<32x32xf32>, i32 -> vector<32x32xf32>
    %c7_i32_16 = arith.constant 7 : i32
    %51 = vector.broadcast %c7_i32_16 : i32 to vector<32x32xi32>
    %52 = arith.cmpi eq, %49, %51 : vector<32x32xi32>
    %53 = arith.select %52, %50, %32 : vector<32x32xi1>, vector<32x32xf32>
    %54 = arith.addf %31, %53 : vector<32x32xf32>
    %55 = arith.addf %54, %6 : vector<32x32xf32>
    %56 = arith.addf %55, %8 : vector<32x32xf32>
    %c0_17 = arith.constant 0 : index
    %c0_18 = arith.constant 0 : index
    %57 = vector.load %arg4[%c0_17, %c0_18] : memref<32x32xf32, #tpu.memory_space<vmem>>, vector<32x32xf32>
    tpu.vector_store %arg4[%c0_17, %c0_18], %56 {strides = array<i32>} : memref<32x32xf32, #tpu.memory_space<vmem>>, vector<32x32xf32>,
    return
  }
  func.func @transform_0(%arg0: i32) -> (i32, i32) {
    %c0_i32 = arith.constant 0 : i32
    %c0_i32_0 = arith.constant 0 : i32
    return %arg0, %c0_i32 : i32, i32
  }
  func.func @transform_1(%arg0: i32) -> (i32, i32) {
    %c0_i32 = arith.constant 0 : i32
    %c0_i32_0 = arith.constant 0 : i32
    %c0_i32_1 = arith.constant 0 : i32
    return %c0_i32, %c0_i32_0 : i32, i32
  }
  func.func @transform_2(%arg0: i32) -> (i32, i32) {
    %c0_i32 = arith.constant 0 : i32
    %c0_i32_0 = arith.constant 0 : i32
    %c0_i32_1 = arith.constant 0 : i32
    return %c0_i32, %c0_i32_0 : i32, i32
  }
  func.func @transform_3(%arg0: i32) -> (i32, i32) {
    %c0_i32 = arith.constant 0 : i32
    %c0_i32_0 = arith.constant 0 : i32
    return %arg0, %c0_i32 : i32, i32
  }
}

</mosaic_0001>

<bundles_post_ra>
// kernel: tpu_custom_call.1
= control target key start
LH: loop header
LB: loop body
LE: loop exit
PB: predicated region body
PF: predicated region fallthrough
CT: control target
= control target key end

     0   :  { %8 = vsyncpa [#allocation3], 0  ;;  %s651_s0 = inlined_call_operand.hbm [shape: bf16[32,100], index: 0, kind: input, shape index: {}]   ;;  %s652_s1 = inlined_call_operand.hbm [shape: bf16[100,128], index: 1, kind: input, shape index: {}]   ;;  %s653_s2 = inlined_call_operand.hbm [shape: f32[8,32], index: 2, kind: input, shape index: {}]   ;;  %s654_s3 = inlined_call_operand.hbm [shape: f32[32,32], index: 3, kind: output, shape index: {}]  }
   0x1   :  { %9 = vsyncpa [#allocation6], 0 }
   0x2   :  { %10 = vsyncpa [#allocation4], 0  ;;  %s500_s12 = smov [#allocation5]   ;;  %s501_s14 = smov [#allocation2]  }
   0x3   :  { %s28_s13 = sshll.u32 %s500_s12, 4  ;;  %s16_s15 = sshll.u32 %s501_s14, 4  ;;  %s29_s13 = int_to_ptr.vmem [resolvable:$true] %s28_s13  ;;  %s530_s15 = int_to_ptr.vmem [resolvable:$true] %s16_s15 }
   0x4   :  { %s406_s18 = scalar_lea.hbm %s652_s1, 832 }
   0x5   :  { %p407_p0 = scmp.ne.s32.totalorder %s652_s1, %s406_s18  ;;  %p410_p1 = scmp.lt.u32.totalorder %s406_s18, %s652_s1 }
   0x7   :  { %p412_p2 = pnand %p410_p1, %p407_p0 }
   0x9   :  { %415 = shalt.err (!%p412_p2)
}
   0xa   :  { %s416_s23 = scalar_lea.vmem %s29_s13, 832  ;;  %p421_p4 = scmp.lt.s32.totalorder %s29_s13, %s29_s13 }
   0xb   :  { %p417_p3 = scmp.ne.s32.totalorder %s29_s13, %s416_s23  ;;  %p422_p5 = scmp.lt.s32.totalorder %s416_s23, %s416_s23 }
   0xd   :  { %p423_p6 = por %p422_p5, %p421_p4 }
   0xf   :  { %p424_p7 = pnand %p423_p6, %p417_p3 }
  0x11   :  { %427 = shalt.err (!%p424_p7)
}
  0x12   :  { %s502_s24 = smov 64   ;;  %s503_s25 = smov 4  }
  0x13   :  { %34 = dma.hbm_to_vmem [thread:$0]  %s652_s1, 832, %s29_s13, [#allocation6], %s502_s24, %s502_s24, %s503_s25  }
  0x14   :  { %s428_s30 = scalar_lea.hbm %s651_s0, 256 }
  0x15   :  { %p429_p8 = scmp.ne.s32.totalorder %s651_s0, %s428_s30  ;;  %p432_p9 = scmp.lt.u32.totalorder %s428_s30, %s651_s0 }
  0x17   :  { %p434_p10 = pnand %p432_p9, %p429_p8 }
  0x19   :  { %437 = shalt.err (!%p434_p10)
}
  0x1a   :  { %s438_s8 = scalar_lea.vmem %s530_s15, 256  ;;  %p443_p12 = scmp.lt.s32.totalorder %s530_s15, %s530_s15 }
  0x1b   :  { %p439_p11 = scmp.ne.s32.totalorder %s530_s15, %s438_s8  ;;  %p444_p13 = scmp.lt.s32.totalorder %s438_s8, %s438_s8 }
  0x1d   :  { %p445_p0 = por %p444_p13, %p443_p12 }
  0x1f   :  { %p446_p1 = pnand %p445_p0, %p439_p11 }
  0x21   :  { %449 = shalt.err (!%p446_p1)
}
  0x22   :  { %22 = dma.hbm_to_vmem [thread:$0]  %s651_s0, 256, %s530_s15, [#allocation3], %s502_s24, %s502_s24, %s503_s25  }
  0x23   :  { %s504_s10 = smov [#allocation7]   ;;  %s450_s14 = scalar_lea.hbm %s653_s2, 128 }
  0x24   :  { %s41_s11 = sshll.u32 %s504_s10, 4  ;;  %p451_p2 = scmp.ne.s32.totalorder %s653_s2, %s450_s14  ;;  %s42_s11 = int_to_ptr.vmem [resolvable:$true] %s41_s11 }
  0x25   :  { %p454_p3 = scmp.lt.u32.totalorder %s450_s14, %s653_s2 }
  0x27   :  { %p456_p4 = pnand %p454_p3, %p451_p2 }
  0x29   :  { %459 = shalt.err (!%p456_p4)
}
  0x2a   :  { %s460_s20 = scalar_lea.vmem %s42_s11, 128  ;;  %p465_p6 = scmp.lt.s32.totalorder %s42_s11, %s42_s11 }
  0x2b   :  { %p461_p5 = scmp.ne.s32.totalorder %s42_s11, %s460_s20  ;;  %p466_p7 = scmp.lt.s32.totalorder %s460_s20, %s460_s20 }
  0x2d   :  { %p467_p8 = por %p466_p7, %p465_p6 }
  0x2f   :  { %p468_p9 = pnand %p467_p8, %p461_p5 }
  0x31   :  { %471 = shalt.err (!%p468_p9)
}
  0x32   :  { %44 = dma.hbm_to_vmem [thread:$0]  %s653_s2, 128, %s42_s11, [#allocation6]  }
  0x33   :  { %494 = dma.done.wait [#allocation3], 256  }
  0x34   :  { %495 = vsyncadd [#allocation3], 4294967040 }
  0x35   :  { %496 = dma.done.wait [#allocation6], 960  }
  0x36   :  { %497 = vsyncadd [#allocation6], 4294966336  ;;  %v397_v0 = vld [vmem:[#allocation5] sm:$0xff]   ;;  %v398_v1 = vld [vmem:[#allocation5 + $0x8] sm:$0xff]   ;;  %vm121_vm0 = vcmask 818176   ;;  %vm128_vm1 = vcmask 1041408   ;;  %v186_v10 = vlaneseq }
  0x37   :  { %368 = vmatprep.subr.bf16.mxu0 %v397_v0  ;;  %v399_v2 = vld [vmem:[#allocation5 + $0x10] sm:$0xff]   ;;  %v400_v4 = vld [vmem:[#allocation5 + $0x18] sm:$0xff]   ;;  %v401_v5 = vld [vmem:[#allocation5 + $0x20] sm:$0xff]   ;;  %s505_s2 = smov 96   ;;  %s506_s21 = smov 32   ;;  %vm325_vm12 = vcmask 261120  }
  0x38   :  { %369 = vmatpush3.bf16.msra.mxu0 %v397_v0  ;;  %v404_v3 = vld [vmem:[#allocation2] sm:$0xff]   ;;  %v402_v6 = vld [vmem:[#allocation5 + $0x28] sm:$0xff]   ;;  %v405_v9 = vld [vmem:[#allocation2 + $0x8] sm:$0xff]   ;;  %v579_v11 = vshrl.u32 %v186_v10, 7  ;;  %s507_s22 = smov [#allocation8]  }
  0x39   :  { %370 = vmatprep.subr.bf16.mxu0 %v398_v1  ;;  %382 = vmatprep.mubr.msk.bf16.mxu0 %vm121_vm0, %v404_v3  ;;  %v403_v7 = vld [vmem:[#allocation5 + $0x30] ss:$0 sps:$4 sm:$0x33]   ;;  %s335_s23 = sshll.u32 %s507_s22, 4  ;;  %s336_s23 = int_to_ptr.vmem [resolvable:$true] %s335_s23 }
  0x3a   :  { %v130_v8 = vsel %vm128_vm1, %v403_v7, 0  ;;  %v195_v12 = vadd.s32 24, %v579_v11  ;;  %v194_v13 = vadd.s32 16, %v579_v11  ;;  %v193_v14 = vadd.s32 8, %v579_v11  ;;  %p477_p11 = scmp.lt.s32.totalorder %s336_s23, %s336_s23 }
  0x3b   :  { %v200_v18 = vand.u32 7, %v579_v11  ;;  %vm188_vm2 = vcmp.lt.s32.totalorder %v579_v11, 1  ;;  %vm288_vm7 = vcmp.lt.s32.totalorder %v579_v11, 7 }
  0x3c   :  { %371 = vmatpush3.bf16.msra.mxu0 %v398_v1  ;;  %v221_v15 = vand.u32 7, %v195_v12  ;;  %v214_v17 = vand.u32 7, %v194_v13  ;;  %v207_v19 = vand.u32 7, %v193_v14 }
  0x3d   :  { %372 = vmatprep.subr.bf16.mxu0 %v399_v2  ;;  %vm595_vm5 = vcmp.eq.s32.totalorder %v200_v18, 0  ;;  %vm619_vm9 = vcmp.eq.s32.totalorder %v200_v18, 7 }
  0x3e   :  { %vm587_vm3 = vcmp.eq.s32.totalorder %v221_v15, 0  ;;  %vm591_vm4 = vcmp.eq.s32.totalorder %v214_v17, 0  ;;  %vm599_vm6 = vcmp.eq.s32.totalorder %v207_v19, 0  ;;  %vm615_vm8 = vcmp.eq.s32.totalorder %v207_v19, 7 }
  0x3f   :  { %vm623_vm10 = vcmp.eq.s32.totalorder %v214_v17, 7  ;;  %vm627_vm11 = vcmp.eq.s32.totalorder %v221_v15, 7 }
  0x40   :  { %373 = vmatpush3.bf16.msra.mxu0 %v399_v2 }
  0x41   :  { %374 = vmatprep.subr.bf16.mxu0 %v400_v4 }
  0x44   :  { %375 = vmatpush3.bf16.msra.mxu0 %v400_v4 }
  0x45   :  { %376 = vmatprep.subr.bf16.mxu0 %v401_v5 }
  0x48   :  { %377 = vmatpush3.bf16.msra.mxu0 %v401_v5 }
  0x49   :  { %378 = vmatprep.subr.bf16.mxu0 %v402_v6 }
  0x4c   :  { %379 = vmatpush3.bf16.msra.mxu0 %v402_v6  ;;  %v181_v6 = vld [vmem:[#allocation7] sm:$0xff] }
  0x4d   :  { %386 = vmatprep.subr.msk.bf16.mxu0 %vm128_vm1, %v403_v7 }
  0x50   :  { %381 = vmatpush3.bf16.msra.mxu0 %v130_v8 }
  0x53   :  { %383 = vmatmul.mubr.msk.bf16.vlgmr.msra.gmra.mrb[0].mxu0 %vm121_vm0, %v405_v9 }
 0x126   :  { %v384_v16 = vpop.f32.mrb[0].mxu0 }
 0x127   :  { %260 = vrot.lane.b32.xlu0 %v384_v16, %s505_s2  ;;  %276 = vrot.lane.b32.xlu1 %v384_v16, %s502_s24  ;;  %v166_v20 = vpop.f32.mrb[1].mxu0  ;;  %v184_v23 = vrot.slane %v384_v16, 7 }
 0x128   :  { %v182_v21 = vrot.slane %v166_v20, 7  ;;  %v385_v22 = vpop.f32.mrb[2].mxu0 }
 0x129   :  { %v185_v24 = vrot.slane %v385_v22, 7  ;;  %v169_v25 = vpop.f32.mrb[3].mxu0 }
 0x12a   :  { %v183_v27 = vrot.slane %v169_v25, 7 }
 0x12b   :  { %272 = vrot.lane.b32.xlu0 %v166_v20, %s502_s24  ;;  %278 = vrot.lane.b32.xlu1 %v385_v22, %s502_s24  ;;  %v189_v31 = vsel %vm188_vm2, %v184_v23, %v185_v24  ;;  %v192_v32 = vsel %vm188_vm2, %v185_v24, %v182_v21 }
 0x12c   :  { %v190_v33 = vsel %vm188_vm2, %v183_v27, %v184_v23  ;;  %v191_v34 = vsel %vm188_vm2, %v182_v21, %v183_v27  ;;  %v251_v35 = vsel %vm587_vm3, %v192_v32, %v189_v31 }
 0x12d   :  { %v250_v36 = vsel %vm591_vm4, %v189_v31, %v190_v33  ;;  %v248_v37 = vsel %vm595_vm5, %v191_v34, %v192_v32  ;;  %v249_v38 = vsel %vm599_vm6, %v190_v33, %v191_v34 }
 0x12f   :  { %256 = vrot.lane.b32.xlu0 %v166_v20, %s505_s2  ;;  %262 = vrot.lane.b32.xlu1 %v385_v22, %s505_s2 }
 0x133   :  { %258 = vrot.lane.b32.xlu1 %v169_v25, %s505_s2  ;;  %274 = vrot.lane.b32.xlu0 %v169_v25, %s502_s24  ;;  %s472_s24 = scalar_lea.vmem %s336_s23, 512 }
 0x134   :  { %p473_p10 = scmp.ne.s32.totalorder %s336_s23, %s472_s24  ;;  %p478_p12 = scmp.lt.s32.totalorder %s472_s24, %s472_s24 }
 0x136   :  { %p479_p13 = por %p478_p12, %p477_p11 }
 0x137   :  { %307 = vrot.lane.b32.xlu1 %v169_v25, %s506_s21  ;;  %305 = vrot.lane.b32.xlu0 %v166_v20, %s506_s21 }
 0x138   :  { %p480_p0 = pnand %p479_p13, %p473_p10 }
 0x13b   :  { %311 = vrot.lane.b32.xlu1 %v385_v22, %s506_s21  ;;  %309 = vrot.lane.b32.xlu0 %v384_v16, %s506_s21 }
 0x199   :  { %v261_v39 = vpop.permute.xlu0 %260  ;;  %v277_v40 = vpop.permute.xlu1 %276 }
 0x19a   :  { %v286_v47 = vrot.slane %v277_v40, 1  ;;  %v270_v3 = vadd.f32 %v261_v39, %v250_v36 }
 0x19d   :  { %v273_v41 = vpop.permute.xlu0 %272  ;;  %v279_v42 = vpop.permute.xlu1 %278 }
 0x19e   :  { %v284_v45 = vrot.slane %v273_v41, 1  ;;  %v287_v46 = vrot.slane %v279_v42, 1 }
 0x1a0   :  { %v289_v54 = vsel %vm288_vm7, %v286_v47, %v287_v46  ;;  %v292_v55 = vsel %vm288_vm7, %v287_v46, %v284_v45 }
 0x1a1   :  { %v257_v43 = vpop.permute.xlu0 %256  ;;  %v263_v44 = vpop.permute.xlu1 %262  ;;  %v300_v7 = vsel %vm627_vm11, %v289_v54, %v292_v55 }
 0x1a2   :  { %v268_v56 = vadd.f32 %v257_v43, %v248_v37  ;;  %v271_v58 = vadd.f32 %v263_v44, %v251_v35 }
 0x1a4   :  { %v304_v10 = vadd.f32 %v300_v7, %v271_v58 }
 0x1a5   :  { %v259_v48 = vpop.permute.xlu1 %258  ;;  %v275_v49 = vpop.permute.xlu0 %274 }
 0x1a6   :  { %v285_v50 = vrot.slane %v275_v49, 1  ;;  %v269_v59 = vadd.f32 %v259_v48, %v249_v38 }
 0x1a8   :  { %v290_v60 = vsel %vm288_vm7, %v285_v50, %v286_v47  ;;  %v291_v61 = vsel %vm288_vm7, %v284_v45, %v285_v50 }
 0x1a9   :  { %v308_v62 = vpop.permute.xlu1 %307  ;;  %v298_v63 = vsel %vm615_vm8, %v291_v61, %v290_v60  ;;  %v297_v0 = vsel %vm619_vm9, %v292_v55, %v291_v61  ;;  %v306_v1 = vpop.permute.xlu0 %305  ;;  %v299_v2 = vsel %vm623_vm10, %v290_v60, %v289_v54 }
 0x1aa   :  { %v302_v4 = vadd.f32 %v298_v63, %v269_v59  ;;  %v301_v5 = vadd.f32 %v297_v0, %v268_v56  ;;  %v303_v11 = vadd.f32 %v299_v2, %v270_v3 }
 0x1ac   :  { %v318_v8 = vadd.f32 %v308_v62, %v302_v4  ;;  %v317_v9 = vadd.f32 %v306_v1, %v301_v5 }
 0x1ad   :  { %v312_v12 = vpop.permute.xlu1 %311  ;;  %v310_v13 = vpop.permute.xlu0 %309 }
 0x1ae   :  { %v322_v14 = vadd.f32 %v318_v8, %v181_v6  ;;  %v321_v15 = vadd.f32 %v317_v9, %v181_v6  ;;  %v320_v16 = vadd.f32 %v312_v12, %v304_v10  ;;  %v319_v17 = vadd.f32 %v310_v13, %v303_v11 }
 0x1b0   :  { %327 = vst.msk [vmem:[#allocation8 + $0x8] sm:$0xff] %vm325_vm12, %v322_v14  ;;  %326 = vst.msk [vmem:[#allocation8] sm:$0xff] %vm325_vm12, %v321_v15  ;;  %v324_v18 = vadd.f32 %v320_v16, %v181_v6  ;;  %v323_v19 = vadd.f32 %v319_v17, %v181_v6 }
 0x1b2   :  { %329 = vst.msk [vmem:[#allocation8 + $0x18] sm:$0xff] %vm325_vm12, %v324_v18  ;;  %328 = vst.msk [vmem:[#allocation8 + $0x10] sm:$0xff] %vm325_vm12, %v323_v19 }
 0x1b3   :  { %483 = shalt.err (!%p480_p0)
}
 0x1b4   :  { %s484_s27 = scalar_lea.hbm %s654_s3, 512 }
 0x1b5   :  { %p485_p1 = scmp.ne.s32.totalorder %s654_s3, %s484_s27  ;;  %p488_p2 = scmp.lt.u32.totalorder %s484_s27, %s654_s3 }
 0x1b7   :  { %p490_p3 = pnand %p488_p2, %p485_p1 }
 0x1b9   :  { %493 = shalt.err (!%p490_p3)
}
 0x1ba   :  { %s508_s5 = smov 128   ;;  %s509_s6 = smov 8  }
 0x1bb   :  { %341 = dma.vmem_to_hbm [thread:$0]  %s336_s23, 512, %s654_s3, [#allocation4], %s508_s5, %s508_s5, %s509_s6  }
 0x1bc   :  { %498 = dma.done.wait [#allocation4], 512  }
 0x1bd   :  { %499 = vsyncadd [#allocation4], 4294966784 }
 0x1be   :  { %345 = vsyncpa [#allocation3], 1 }
 0x1bf   :  { %346 = vsyncpa [#allocation6], 1 }
 0x1c0   :  { %347 = vsyncpa [#allocation4], 1 }

</bundles_post_ra>
